<compile_context>
chip_gen: v7x
topology: tpu7x:2x2x1
jax: 0.10.0
libtpu: 0.0.40
codegen_flags: <defaults>
</compile_context>

<pallas_src>
import jax
import jax.numpy as jnp
from jax.experimental import pallas as pl
from jax.experimental.pallas import tpu as pltpu

KERNEL_SIZE = 25               # fixed in the PyTorch module
PAD = (KERNEL_SIZE - 1) // 2   # 12


# ----------------------------------------------------------------------------------------------
# Kernels
# ----------------------------------------------------------------------------------------------
def _dlinear_kernel_cols(w_ref, b_ref, x_ref, out_ref):
    # Native-layout path (per-batch, channel tile on lanes):
    # w_ref: (P_pad, L), b_ref: (P_pad, 1), x_ref: (L, tile_c), out_ref: (P_pad, tile_c)
    y = jnp.dot(w_ref[...], x_ref[...], preferred_element_type=jnp.float32)
    out_ref[...] = (y + b_ref[...]).astype(out_ref.dtype)


def _dlinear_kernel_rows(x_ref, wt_ref, b_ref, out_ref):
    # Small-N path (B*C rows on sublanes, pred_len on lanes):
    # x_ref: (N_pad, L), wt_ref: (L, P), b_ref: (1, P), out_ref: (N_pad, P)
    y = jnp.dot(x_ref[...], wt_ref[...], preferred_element_type=jnp.float32)
    out_ref[...] = (y + b_ref[...]).astype(out_ref.dtype)


# ----------------------------------------------------------------------------------------------
# Parameter-only precompute (hoistable: depends only on weights, not on x)
# ----------------------------------------------------------------------------------------------
def _moving_avg_matrix(seq_len, dtype=jnp.float32):
    """A such that trend = A @ x reproduces AvgPool1d(k=25, stride=1) with replicate padding.

    Built with iota / clip / where (closed-form hit counts), no scatter.
    """
    i = jnp.arange(seq_len, dtype=jnp.int32)[:, None]   # output time index (rows)
    j = jnp.arange(seq_len, dtype=jnp.int32)[None, :]   # input time index (cols)
    interior = (jnp.abs(i - j) <= PAD).astype(dtype)                              # (L, L)
    first = jnp.clip(PAD + 1 - i, 0, KERNEL_SIZE).astype(dtype)                   # (L, 1) col 0
    last = jnp.clip(i + PAD + 2 - seq_len, 0, KERNEL_SIZE).astype(dtype)          # (L, 1) col L-1
    counts = jnp.where(j == 0, first, jnp.where(j == seq_len - 1, last, interior))
    return counts / jnp.asarray(KERNEL_SIZE, dtype)


def make_dlinear_params(ws, bs, wt, bt):
    """Fold decomposition + two linears into one (P, L) weight and one (P,) bias (f32)."""
    P, L = ws.shape
    A = _moving_avg_matrix(L, jnp.float32)                                        # (L, L)
    w_eff = ws.astype(jnp.float32) + jnp.dot(
        (wt - ws).astype(jnp.float32), A, preferred_element_type=jnp.float32)     # (P, L)
    b_sum = (bs + bt).astype(jnp.float32)                                         # (P,)
    return w_eff, b_sum


# ----------------------------------------------------------------------------------------------
# Pallas-call wrappers
# ----------------------------------------------------------------------------------------------
def _forward_native(x, w_eff, b_sum):
    """Grid over (batch, channel-tiles); reads (B,L,C) and writes (B,P,C) directly."""
    B, L, C = x.shape
    P = w_eff.shape[0]
    p_pad = ((P + 7) // 8) * 8
    if p_pad != P:
        w_eff = jnp.pad(w_eff, ((0, p_pad - P), (0, 0)))
        b_sum = jnp.pad(b_sum, (0, p_pad - P))
    b2 = b_sum.reshape(p_pad, 1)

    # Channel (lane) tile: full C when it fits, else 1024-lane tiles (multiple of 128).
    tile_c = C if C <= 1024 else 1024
    grid_c = pl.cdiv(C, tile_c)

    dtype_bytes = jnp.dtype(x.dtype).itemsize
    cost = pl.CostEstimate(
        flops=2 * p_pad * L * B * C,
        transcendentals=0,
        bytes_accessed=dtype_bytes * (B * L * C + B * p_pad * C) + 4 * (p_pad * L + p_pad),
    )
    # VMEM budget (double-buffered x/out blocks + resident weight/bias) with 2x headroom,
    # kept within v7x's smaller VMEM.
    vmem_need = 4 * (2 * L * tile_c + 2 * p_pad * tile_c + p_pad * L + p_pad * 8)
    vmem_limit = int(min(max(2 * vmem_need, 32 * 1024 * 1024), 64 * 1024 * 1024))

    out = pl.pallas_call(
        _dlinear_kernel_cols,
        out_shape=jax.ShapeDtypeStruct((B, p_pad, C), x.dtype),
        grid_spec=pltpu.PrefetchScalarGridSpec(
            num_scalar_prefetch=0,
            grid=(B, grid_c),
            in_specs=[
                pl.BlockSpec((p_pad, L), lambda b, c: (0, 0)),
                pl.BlockSpec((p_pad, 1), lambda b, c: (0, 0)),
                pl.BlockSpec((None, L, tile_c), lambda b, c: (b, 0, c)),
            ],
            out_specs=pl.BlockSpec((None, p_pad, tile_c), lambda b, c: (b, 0, c)),
        ),
        compiler_params=pltpu.CompilerParams(
            dimension_semantics=("parallel", "parallel"),
            vmem_limit_bytes=vmem_limit),
        cost_estimate=cost,
    )(w_eff.astype(x.dtype), b2, x)                                               # (B, p_pad, C)

    return out[:, :P, :] if p_pad != P else out


def _forward_small_n(x, w_eff, b_sum):
    """B*C small: put B*C on sublanes and pred_len on lanes (lane-dense output)."""
    B, L, C = x.shape
    P = w_eff.shape[0]
    N = B * C
    n_pad = ((N + 7) // 8) * 8

    x2 = jnp.transpose(x, (0, 2, 1)).reshape(N, L)        # tiny (N*L elements)
    if n_pad != N:
        x2 = jnp.pad(x2, ((0, n_pad - N), (0, 0)))
    wT = jnp.transpose(w_eff).astype(x.dtype)             # (L, P)
    b_row = b_sum.reshape(1, P)

    dtype_bytes = jnp.dtype(x.dtype).itemsize
    cost = pl.CostEstimate(
        flops=2 * n_pad * L * P,
        transcendentals=0,
        bytes_accessed=dtype_bytes * (n_pad * L + n_pad * P) + 4 * (L * P + P),
    )

    out2 = pl.pallas_call(
        _dlinear_kernel_rows,
        out_shape=jax.ShapeDtypeStruct((n_pad, P), x.dtype),
        grid_spec=pltpu.PrefetchScalarGridSpec(
            num_scalar_prefetch=0,
            grid=(1,),
            in_specs=[
                pl.BlockSpec((n_pad, L), lambda i: (0, 0)),
                pl.BlockSpec((L, P), lambda i: (0, 0)),
                pl.BlockSpec((1, P), lambda i: (0, 0)),
            ],
            out_specs=pl.BlockSpec((n_pad, P), lambda i: (0, 0)),
        ),
        compiler_params=pltpu.CompilerParams(
            dimension_semantics=("arbitrary",)),
        cost_estimate=cost,
    )(x2, wT, b_row)                                                              # (n_pad, P)

    out2 = out2[:N]
    return jnp.transpose(out2.reshape(B, C, P), (0, 2, 1))                        # (B, P, C)


def dlinear_apply(x, w_eff, b_sum):
    B, L, C = x.shape
    if B * C <= 128:
        return _forward_small_n(x, w_eff, b_sum)
    return _forward_native(x, w_eff, b_sum)


def dlinear_forward(x, ws, bs, wt, bt):
    """x: (B, seq_len, C) -> (B, pred_len, C)"""
    w_eff, b_sum = make_dlinear_params(ws, bs, wt, bt)
    return dlinear_apply(x, w_eff, b_sum)


dlinear_forward_jit = jax.jit(dlinear_forward)


# ----------------------------------------------------------------------------------------------
# Pure-JAX reference (explicit replicate pad + moving avg + two linears), matches PyTorch.
# ----------------------------------------------------------------------------------------------
def dlinear_reference(x, ws, bs, wt, bt):
    B, L, C = x.shape
    front = jnp.repeat(x[:, 0:1, :], PAD, axis=1)
    end = jnp.repeat(x[:, -1:, :], PAD, axis=1)
    xp = jnp.concatenate([front, x, end], axis=1)
    trend = jnp.mean(
        jnp.stack([xp[:, k:k + L, :] for k in range(KERNEL_SIZE)], axis=0), axis=0)
    seasonal = x - trend
    s = jnp.einsum("blc,pl->bpc", seasonal, ws) + bs[None, :, None]
    t = jnp.einsum("blc,pl->bpc", trend, wt) + bt[None, :, None]
    return s + t


if __name__ == "__main__":
    key = jax.random.PRNGKey(0)

    def init_params(k, L, P):
        kws, kbs, kwt, kbt = jax.random.split(k, 4)
        bound = 1.0 / jnp.sqrt(jnp.float32(L))
        ws = jax.random.uniform(kws, (P, L), jnp.float32, -bound, bound)
        bs = jax.random.uniform(kbs, (P,), jnp.float32, -bound, bound)
        wt = jax.random.uniform(kwt, (P, L), jnp.float32, -bound, bound)
        bt = jax.random.uniform(kbt, (P,), jnp.float32, -bound, bound)
        return ws, bs, wt, bt

    k1, k2, kx1, kx2 = jax.random.split(key, 4)

    # Config 1 (small-N path): batch=2, channels=8, seq_len=32, pred_len=16.
    B, C, L, P = 2, 8, 32, 16
    x = jax.random.normal(kx1, (B, L, C), dtype=jnp.float32)
    ws, bs, wt, bt = init_params(k1, L, P)
    out = jax.block_until_ready(dlinear_forward_jit(x, ws, bs, wt, bt))
    ref = dlinear_reference(x, ws, bs, wt, bt)
    assert out.shape == (B, P, C), out.shape
    assert jnp.allclose(out, ref, atol=1e-4, rtol=1e-4), float(jnp.max(jnp.abs(out - ref)))

    # Config 2 (native-layout path, exercises pred_len padding): batch=2, channels=256,
    # seq_len=40, pred_len=20.
    B2, C2, L2, P2 = 2, 256, 40, 20
    x2 = jax.random.normal(kx2, (B2, L2, C2), dtype=jnp.float32)
    ws2, bs2, wt2, bt2 = init_params(k2, L2, P2)
    out2 = jax.block_until_ready(dlinear_forward_jit(x2, ws2, bs2, wt2, bt2))
    ref2 = dlinear_reference(x2, ws2, bs2, wt2, bt2)
    assert out2.shape == (B2, P2, C2), out2.shape
    assert jnp.allclose(out2, ref2, atol=1e-4, rtol=1e-4), float(jnp.max(jnp.abs(out2 - ref2)))

    print("KERNEL_OK")
</pallas_src>

<mosaic_0001>
module attributes {stable_mosaic.version = 11 : i64} {
  func.func @_dlinear_kernel_rows(%arg0: i32, %arg1: memref<16x32xf32, #tpu.memory_space<vmem>>, %arg2: memref<32x16xf32, #tpu.memory_space<vmem>>, %arg3: memref<1x16xf32, #tpu.memory_space<vmem>>, %arg4: memref<16x16xf32, #tpu.memory_space<vmem>>) attributes {dimension_semantics = [#tpu.dimension_semantics<arbitrary>], iteration_bounds = array<i64: 1>, scalar_prefetch = 0 : i64, scratch_operands = 0 : i64, tpu.core_type = #tpu.core_type<tc>, window_params = [{pipeline_mode = #tpu.pipeline_mode<synchronous>, transform_indices = @transform_0, window_bounds = array<i64: 16, 32>}, {pipeline_mode = #tpu.pipeline_mode<synchronous>, transform_indices = @transform_1, window_bounds = array<i64: 32, 16>}, {pipeline_mode = #tpu.pipeline_mode<synchronous>, transform_indices = @transform_2, window_bounds = array<i64: 1, 16>}, {pipeline_mode = #tpu.pipeline_mode<synchronous>, transform_indices = @transform_3, window_bounds = array<i64: 16, 16>}]} {
    %c0 = arith.constant 0 : index
    %c0_0 = arith.constant 0 : index
    %0 = vector.load %arg1[%c0, %c0_0] : memref<16x32xf32, #tpu.memory_space<vmem>>, vector<16x32xf32>
    %c0_1 = arith.constant 0 : index
    %c0_2 = arith.constant 0 : index
    %1 = vector.load %arg2[%c0_1, %c0_2] : memref<32x16xf32, #tpu.memory_space<vmem>>, vector<32x16xf32>
    %cst = arith.constant dense<0.000000e+00> : vector<16x16xf32>
    %2 = tpu.matmul %0, %1, %cst {dimension_numbers = #tpu.dot_dimension_numbers<[1], [0], [0], [1], [0, 0, 1, 1], [], []>} : vector<16x32xf32>, vector<32x16xf32>, vector<16x16xf32> -> vector<16x16xf32>
    %c0_3 = arith.constant 0 : index
    %c0_4 = arith.constant 0 : index
    %3 = vector.load %arg3[%c0_3, %c0_4] : memref<1x16xf32, #tpu.memory_space<vmem>>, vector<1x16xf32>
    %4 = vector.broadcast %3 : vector<1x16xf32> to vector<16x16xf32>
    %5 = arith.addf %2, %4 : vector<16x16xf32>
    %c0_5 = arith.constant 0 : index
    %c0_6 = arith.constant 0 : index
    %6 = vector.load %arg4[%c0_5, %c0_6] : memref<16x16xf32, #tpu.memory_space<vmem>>, vector<16x16xf32>
    tpu.vector_store %arg4[%c0_5, %c0_6], %5 {strides = array<i32>} : memref<16x16xf32, #tpu.memory_space<vmem>>, vector<16x16xf32>,
    return
  }
  func.func @transform_0(%arg0: i32) -> (i32, i32) {
    %c0_i32 = arith.constant 0 : i32
    %c0_i32_0 = arith.constant 0 : i32
    %c0_i32_1 = arith.constant 0 : i32
    return %c0_i32, %c0_i32_0 : i32, i32
  }
  func.func @transform_1(%arg0: i32) -> (i32, i32) {
    %c0_i32 = arith.constant 0 : i32
    %c0_i32_0 = arith.constant 0 : i32
    %c0_i32_1 = arith.constant 0 : i32
    return %c0_i32, %c0_i32_0 : i32, i32
  }
  func.func @transform_2(%arg0: i32) -> (i32, i32) {
    %c0_i32 = arith.constant 0 : i32
    %c0_i32_0 = arith.constant 0 : i32
    %c0_i32_1 = arith.constant 0 : i32
    return %c0_i32, %c0_i32_0 : i32, i32
  }
  func.func @transform_3(%arg0: i32) -> (i32, i32) {
    %c0_i32 = arith.constant 0 : i32
    %c0_i32_0 = arith.constant 0 : i32
    %c0_i32_1 = arith.constant 0 : i32
    return %c0_i32, %c0_i32_0 : i32, i32
  }
}

</mosaic_0001>

<bundles_post_ra>
// kernel: dlinear_forward.1
= control target key start
LH: loop header
LB: loop body
LE: loop exit
PB: predicated region body
PF: predicated region fallthrough
CT: control target
= control target key end

     0   :  { %vm28_vm0 = vcmask 261120   ;;  %s240_s0 = inlined_call_operand.vmem [shape: f32[16,32], index: 0, kind: input, shape index: {}]   ;;  %s241_s1 = inlined_call_operand.vmem [shape: f32[32,16], index: 1, kind: input, shape index: {}]   ;;  %s242_s2 = inlined_call_operand.vmem [shape: f32[1,16], index: 2, kind: input, shape index: {}]   ;;  %s243_s3 = inlined_call_operand.hbm [shape: f32[16,16], index: 3, kind: output, shape index: {}]  }
   0x1   :  { %v17_v0 = vld [vmem:[%s241_s1] sm:$0xff]  ;;  %v18_v1 = vld [vmem:[%s241_s1 + $0x8] sm:$0xff]  ;;  %v19_v2 = vld [vmem:[%s241_s1 + $0x10] sm:$0xff] }
   0x2   :  { %v149_v3 = vpack.c.bf16 %v18_v1, %v17_v0  ;;  %v20_v4 = vld [vmem:[%s241_s1 + $0x18] sm:$0xff]  ;;  %v15_v5 = vld [vmem:[%s240_s0] sm:$0xff] }
   0x3   :  { %v153_v6 = vpack.c.bf16 %v20_v4, %v19_v2  ;;  %146 = vmatprep.mubr.msk.f32.mxu0 %vm28_vm0, %v15_v5 }
   0x4   :  { %8 = vsyncpa [#allocation3], 0  ;;  %150 = vmatprep.subr.bf16.mxu0 %v149_v3  ;;  %v16_v7 = vld [vmem:[%s240_s0 + $0x8] sm:$0xff]  ;;  %v129_v8 = vld [vmem:[%s242_s2] ss:$0 sm:$0xff]  ;;  %s184_s1 = smov [#allocation2]  }
   0x5   :  { %152 = vmatpush3.bf16.msra.mxu0 %v149_v3  ;;  %s118_s26 = sshll.u32 %s184_s1, 4  ;;  %vm110_vm1 = vcmask 130048   ;;  %s119_s26 = int_to_ptr.vmem [resolvable:$true] %s118_s26 }
   0x6   :  { %154 = vmatprep.subr.bf16.mxu0 %v153_v6  ;;  %s160_s27 = scalar_lea.vmem %s119_s26, 256  ;;  %p165_p1 = scmp.lt.s32.totalorder %s119_s26, %s119_s26 }
   0x7   :  { %p161_p0 = scmp.ne.s32.totalorder %s119_s26, %s160_s27  ;;  %p166_p2 = scmp.lt.s32.totalorder %s160_s27, %s160_s27 }
   0x9   :  { %156 = vmatpush3.bf16.msra.mxu0 %v153_v6  ;;  %p167_p3 = por %p166_p2, %p165_p1 }
   0xb   :  { %p168_p4 = pnand %p167_p3, %p161_p0 }
   0xc   :  { %147 = vmatmul.mubr.msk.f32.vlgmr.msra.gmra.mrb[0].mxu0 %vm28_vm0, %v16_v7 }
  0xdf   :  { %v148_v9 = vpop.f32.mrb[0].mxu0 }
  0xe0   :  { %v107_v10 = vadd.f32 %v148_v9, %v129_v8  ;;  %v101_v11 = vpop.f32.mrb[1].mxu0 }
  0xe1   :  { %v102_v12 = vadd.f32 %v129_v8, %v101_v11 }
  0xe2   :  { %112 = vst.msk [vmem:[#allocation2 + $0x8] sm:$0xff] %vm110_vm1, %v107_v10 }
  0xe3   :  { %111 = vst.msk [vmem:[#allocation2] sm:$0xff] %vm110_vm1, %v102_v12 }
  0xe4   :  { %171 = shalt.err (!%p168_p4)
}
  0xe5   :  { %s172_s2 = scalar_lea.hbm %s243_s3, 256 }
  0xe6   :  { %p173_p5 = scmp.ne.s32.totalorder %s243_s3, %s172_s2  ;;  %p176_p6 = scmp.lt.u32.totalorder %s172_s2, %s243_s3 }
  0xe8   :  { %p178_p7 = pnand %p176_p6, %p173_p5 }
  0xea   :  { %181 = shalt.err (!%p178_p7)
}
  0xeb   :  { %s185_s6 = smov 128   ;;  %s186_s7 = smov 8  }
  0xec   :  { %124 = dma.vmem_to_hbm [thread:$0]  %s119_s26, 256, %s243_s3, [#allocation3], %s185_s6, %s185_s6, %s186_s7  }
  0xed   :  { %182 = dma.done.wait [#allocation3], 256  }
  0xee   :  { %183 = vsyncadd [#allocation3], 4294967040 }
  0xef   :  { %128 = vsyncpa [#allocation3], 1 }

</bundles_post_ra>
